<compile_context>
chip_gen: v7x
topology: tpu7x:2x2x1
jax: 0.10.0
libtpu: 0.0.40
codegen_flags: <defaults>
</compile_context>

<pallas_src>
import functools

import jax
import jax.numpy as jnp
from jax.experimental import pallas as pl
from jax.experimental.pallas import tpu as pltpu


def _round_up(x: int, m: int) -> int:
    return ((x + m - 1) // m) * m


# Per-input-tile byte budget.  With double-buffered in/out tiles plus ~3
# tile-sized f32 intermediates the total kernel VMEM footprint at this budget
# stays < ~20 MiB, which fits v5e/v6e/v7x (v7x has only 64 MiB physical VMEM).
_TARGET_BLOCK_BYTES = 2 * 1024 * 1024
# Explicit scoped-VMEM limit (v5e defaults to 16 MiB, v6e/v7x to 32 MiB).
_VMEM_LIMIT_BYTES = 32 * 1024 * 1024


def _choose_block_rows(n: int, d: int, itemsize: int) -> int:
    """Pick a sublane-aligned row-block size from the VMEM byte budget."""
    sublane = max(8, 32 // itemsize)          # 8 for f32, 16 for bf16, 32 for int8
    tr = _TARGET_BLOCK_BYTES // (d * itemsize)
    tr = max(sublane, (tr // sublane) * sublane)
    # Never exceed the (sublane-rounded) total row count.
    tr = min(tr, _round_up(max(n, 1), sublane))
    return tr


def _layernorm_kernel(x_ref, alpha_ref, bias_ref, o_ref, *, eps: float, features: int):
    """Block-wide LayerNormalization over the last dim for a (tr, D) row tile."""
    x = x_ref[...].astype(jnp.float32)                        # (tr, D)
    mean = jnp.mean(x, axis=-1, keepdims=True)                # (tr, 1)
    centered = x - mean
    # PyTorch x.std() is the unbiased estimator (divisor N-1).
    var = jnp.sum(centered * centered, axis=-1, keepdims=True) / (features - 1)
    std = jnp.sqrt(var)
    inv = 1.0 / (std + eps)                                   # exact: only (tr,1) elems
    y = alpha_ref[...] * (centered * inv) + bias_ref[...]     # broadcast (1, D)
    o_ref[...] = y.astype(o_ref.dtype)


def layer_norm(x: jax.Array,
               alpha: jax.Array,
               bias: jax.Array,
               *,
               eps: float = 1e-6) -> jax.Array:
    """Pallas LayerNormalization over the last dimension of x."""
    *lead, d = x.shape
    x2 = x.reshape(-1, d)
    n = x2.shape[0]

    itemsize = jnp.dtype(x.dtype).itemsize
    tr = _choose_block_rows(n, d, itemsize)
    grid = pl.cdiv(n, tr)                       # partial last block handled by Pallas
    # TODO(synk): if d is ever not a multiple of 128, pad the feature dim (and
    # mask alpha/bias) in the wrapper to keep the output store lane-dense.

    alpha2 = alpha.reshape(1, d).astype(jnp.float32)
    bias2 = bias.reshape(1, d).astype(jnp.float32)

    cost = pl.CostEstimate(
        flops=8 * n * d,
        transcendentals=n,                                    # one sqrt per row
        bytes_accessed=2 * n * d * itemsize + 2 * d * 4,
    )

    out = pl.pallas_call(
        functools.partial(_layernorm_kernel, eps=eps, features=d),
        out_shape=jax.ShapeDtypeStruct((n, d), x.dtype),
        grid_spec=pltpu.PrefetchScalarGridSpec(
            num_scalar_prefetch=0,
            grid=(grid,),
            in_specs=[
                pl.BlockSpec((tr, d), lambda i: (i, 0)),      # row tile
                pl.BlockSpec((1, d), lambda i: (0, 0)),       # alpha (grid-invariant)
                pl.BlockSpec((1, d), lambda i: (0, 0)),       # bias  (grid-invariant)
            ],
            out_specs=pl.BlockSpec((tr, d), lambda i: (i, 0)),
        ),
        compiler_params=pltpu.CompilerParams(
            dimension_semantics=("parallel",),                # independent row blocks
            vmem_limit_bytes=_VMEM_LIMIT_BYTES,
        ),
        cost_estimate=cost,
    )(x2, alpha2, bias2)

    return out.reshape(*lead, d)


def encoder_forward(x: jax.Array,
                    mask: jax.Array,
                    layer_fns,
                    alpha: jax.Array,
                    bias: jax.Array,
                    *,
                    eps: float = 1e-6) -> jax.Array:
    """Equivalent of Encoder.forward: apply each layer, then the final LayerNorm."""
    # TODO(synk): the nn.ModuleList layers are not defined in the module spec, so
    # they are applied here as user-supplied JAX callables; only the final
    # LayerNormalization is lowered to a Pallas kernel.
    for layer in layer_fns:
        x = layer(x, mask)
    return layer_norm(x, alpha, bias, eps=eps)


if __name__ == "__main__":
    # Small configuration consistent with the module: (batch, seq, features).
    batch, seq, features = 2, 8, 128
    eps = 1e-6

    key = jax.random.PRNGKey(0)
    (k_x,) = jax.random.split(key, 1)

    x = jax.random.normal(k_x, (batch, seq, features), dtype=jnp.float32)
    mask = jnp.ones((batch, 1, seq, seq), dtype=jnp.float32)   # unused by the norm itself

    # LayerNormalization parameters: alpha=ones, bias=zeros (module init).
    alpha = jnp.ones((features,), dtype=jnp.float32)
    bias = jnp.zeros((features,), dtype=jnp.float32)

    # No sub-layers defined in the spec -> Encoder reduces to the final norm.
    out = encoder_forward(x, mask, layer_fns=(), alpha=alpha, bias=bias, eps=eps)
    out = jax.block_until_ready(out)

    # Reference check (plain JAX, mirroring the PyTorch formula incl. unbiased std).
    mean = jnp.mean(x, axis=-1, keepdims=True)
    std = jnp.std(x, axis=-1, keepdims=True, ddof=1)
    ref = alpha * (x - mean) / (std + eps) + bias

    assert out.shape == (batch, seq, features)
    assert jnp.allclose(out, ref, atol=1e-5, rtol=1e-5), "mismatch vs reference"

    print("KERNEL_OK")
</pallas_src>

<mosaic_0001>
module attributes {stable_mosaic.version = 11 : i64} {
  func.func @_layernorm_kernel(%arg0: i32, %arg1: memref<16x128xf32, #tpu.memory_space<vmem>>, %arg2: memref<1x128xf32, #tpu.memory_space<vmem>>, %arg3: memref<1x128xf32, #tpu.memory_space<vmem>>, %arg4: memref<16x128xf32, #tpu.memory_space<vmem>>) attributes {dimension_semantics = [#tpu.dimension_semantics<parallel>], iteration_bounds = array<i64: 1>, scalar_prefetch = 0 : i64, scratch_operands = 0 : i64, tpu.core_type = #tpu.core_type<tc>, window_params = [{transform_indices = @transform_0, window_bounds = array<i64: 16, 128>}, {pipeline_mode = #tpu.pipeline_mode<synchronous>, transform_indices = @transform_1, window_bounds = array<i64: 1, 128>}, {pipeline_mode = #tpu.pipeline_mode<synchronous>, transform_indices = @transform_2, window_bounds = array<i64: 1, 128>}, {transform_indices = @transform_3, window_bounds = array<i64: 16, 128>}]} {
    %c0 = arith.constant 0 : index
    %c0_0 = arith.constant 0 : index
    %0 = vector.load %arg1[%c0, %c0_0] : memref<16x128xf32, #tpu.memory_space<vmem>>, vector<16x128xf32>
    %cst = arith.constant dense<0.000000e+00> : vector<16xf32>
    %1 = vector.multi_reduction <add>, %0, %cst [1] : vector<16x128xf32> to vector<16xf32>
    %2 = vector.shape_cast %1 : vector<16xf32> to vector<16x1xf32>
    %cst_1 = arith.constant 1.280000e+02 : f32
    %3 = vector.broadcast %cst_1 : f32 to vector<16x1xf32>
    %4 = arith.divf %2, %3 : vector<16x1xf32>
    %5 = vector.broadcast %4 : vector<16x1xf32> to vector<16x128xf32>
    %6 = arith.subf %0, %5 : vector<16x128xf32>
    %7 = arith.mulf %6, %6 : vector<16x128xf32>
    %cst_2 = arith.constant dense<0.000000e+00> : vector<16xf32>
    %8 = vector.multi_reduction <add>, %7, %cst_2 [1] : vector<16x128xf32> to vector<16xf32>
    %9 = vector.shape_cast %8 : vector<16xf32> to vector<16x1xf32>
    %cst_3 = arith.constant 1.270000e+02 : f32
    %10 = vector.broadcast %cst_3 : f32 to vector<16x1xf32>
    %11 = arith.divf %9, %10 : vector<16x1xf32>
    %12 = math.sqrt %11 : vector<16x1xf32>
    %cst_4 = arith.constant 9.99999997E-7 : f32
    %13 = vector.broadcast %cst_4 : f32 to vector<16x1xf32>
    %14 = arith.addf %12, %13 : vector<16x1xf32>
    %cst_5 = arith.constant 1.000000e+00 : f32
    %15 = vector.broadcast %cst_5 : f32 to vector<16x1xf32>
    %16 = arith.divf %15, %14 : vector<16x1xf32>
    %c0_6 = arith.constant 0 : index
    %c0_7 = arith.constant 0 : index
    %17 = vector.load %arg2[%c0_6, %c0_7] : memref<1x128xf32, #tpu.memory_space<vmem>>, vector<1x128xf32>
    %18 = vector.broadcast %16 : vector<16x1xf32> to vector<16x128xf32>
    %19 = arith.mulf %6, %18 : vector<16x128xf32>
    %20 = vector.broadcast %17 : vector<1x128xf32> to vector<16x128xf32>
    %21 = arith.mulf %20, %19 : vector<16x128xf32>
    %c0_8 = arith.constant 0 : index
    %c0_9 = arith.constant 0 : index
    %22 = vector.load %arg3[%c0_8, %c0_9] : memref<1x128xf32, #tpu.memory_space<vmem>>, vector<1x128xf32>
    %23 = vector.broadcast %22 : vector<1x128xf32> to vector<16x128xf32>
    %24 = arith.addf %21, %23 : vector<16x128xf32>
    %c0_10 = arith.constant 0 : index
    %c0_11 = arith.constant 0 : index
    %25 = vector.load %arg4[%c0_10, %c0_11] : memref<16x128xf32, #tpu.memory_space<vmem>>, vector<16x128xf32>
    tpu.vector_store %arg4[%c0_10, %c0_11], %24 {strides = array<i32>} : memref<16x128xf32, #tpu.memory_space<vmem>>, vector<16x128xf32>,
    return
  }
  func.func @transform_0(%arg0: i32) -> (i32, i32) {
    %c0_i32 = arith.constant 0 : i32
    %c0_i32_0 = arith.constant 0 : i32
    return %arg0, %c0_i32 : i32, i32
  }
  func.func @transform_1(%arg0: i32) -> (i32, i32) {
    %c0_i32 = arith.constant 0 : i32
    %c0_i32_0 = arith.constant 0 : i32
    %c0_i32_1 = arith.constant 0 : i32
    return %c0_i32, %c0_i32_0 : i32, i32
  }
  func.func @transform_2(%arg0: i32) -> (i32, i32) {
    %c0_i32 = arith.constant 0 : i32
    %c0_i32_0 = arith.constant 0 : i32
    %c0_i32_1 = arith.constant 0 : i32
    return %c0_i32, %c0_i32_0 : i32, i32
  }
  func.func @transform_3(%arg0: i32) -> (i32, i32) {
    %c0_i32 = arith.constant 0 : i32
    %c0_i32_0 = arith.constant 0 : i32
    return %arg0, %c0_i32 : i32, i32
  }
}

</mosaic_0001>

<bundles_post_ra>
// kernel: tpu_custom_call.1
= control target key start
LH: loop header
LB: loop body
LE: loop exit
PB: predicated region body
PF: predicated region fallthrough
CT: control target
= control target key end

     0   :  { %8 = vsyncpa [#allocation3], 0  ;;  %s230_s0 = inlined_call_operand.hbm [shape: f32[16,128], index: 0, kind: input, shape index: {}]   ;;  %s231_s1 = inlined_call_operand.vmem [shape: f32[1,128], index: 1, kind: input, shape index: {}]   ;;  %s232_s2 = inlined_call_operand.vmem [shape: f32[1,128], index: 2, kind: input, shape index: {}]   ;;  %s233_s3 = inlined_call_operand.hbm [shape: f32[16,128], index: 3, kind: output, shape index: {}]  }
   0x1   :  { %9 = vsyncpa [#allocation4], 0  ;;  %s170_s12 = smov [#allocation2]   ;;  %s122_s16 = scalar_lea.hbm %s230_s0, 256 }
   0x2   :  { %s15_s13 = sshll.u32 %s170_s12, 4  ;;  %p123_p0 = scmp.ne.s32.totalorder %s230_s0, %s122_s16  ;;  %s16_s13 = int_to_ptr.vmem [resolvable:$true] %s15_s13 }
   0x3   :  { %p126_p1 = scmp.lt.u32.totalorder %s122_s16, %s230_s0 }
   0x5   :  { %p128_p2 = pnand %p126_p1, %p123_p0 }
   0x7   :  { %131 = shalt.err (!%p128_p2)
}
   0x8   :  { %s132_s21 = scalar_lea.vmem %s16_s13, 256  ;;  %p137_p4 = scmp.lt.s32.totalorder %s16_s13, %s16_s13 }
   0x9   :  { %p133_p3 = scmp.ne.s32.totalorder %s16_s13, %s132_s21  ;;  %p138_p5 = scmp.lt.s32.totalorder %s132_s21, %s132_s21 }
   0xb   :  { %p139_p6 = por %p138_p5, %p137_p4 }
   0xd   :  { %p140_p7 = pnand %p139_p6, %p133_p3 }
   0xf   :  { %143 = shalt.err (!%p140_p7)
}
  0x10   :  { %s171_s22 = smov 128   ;;  %s172_s23 = smov 8  }
  0x11   :  { %21 = dma.hbm_to_vmem [thread:$0]  %s230_s0, 256, %s16_s13, [#allocation3], %s171_s22, %s171_s22, %s172_s23  }
  0x12   :  { %166 = dma.done.wait [#allocation3], 256  }
  0x13   :  { %167 = vsyncadd [#allocation3], 4294967040  ;;  %v29_v0 = vld [vmem:[#allocation2] sm:$0xff]  ;;  %v30_v1 = vld [vmem:[#allocation2 + $0x8] sm:$0xff]  ;;  %s173_s29 = smov [#allocation5]  }
  0x14   :  { %31 = vadd.xlane.f32.xlu0 %v29_v0  ;;  %v108_v27 = vld [vmem:[%s231_s1] ss:$0 sm:$0xff]  ;;  %s96_s30 = sshll.u32 %s173_s29, 4  ;;  %s97_s30 = int_to_ptr.vmem [resolvable:$true] %s96_s30 }
  0x15   :  { %v109_v29 = vld [vmem:[%s232_s2] ss:$0 sm:$0xff]  ;;  %s144_s4 = scalar_lea.vmem %s97_s30, 256  ;;  %p149_p9 = scmp.lt.s32.totalorder %s97_s30, %s97_s30 }
  0x16   :  { %p145_p8 = scmp.ne.s32.totalorder %s97_s30, %s144_s4  ;;  %p150_p10 = scmp.lt.s32.totalorder %s144_s4, %s144_s4 }
  0x18   :  { %33 = vadd.xlane.f32.xlu0 %v30_v1  ;;  %p151_p11 = por %p150_p10, %p149_p9 }
  0x1a   :  { %p152_p12 = pnand %p151_p11, %p145_p8 }
  0xa1   :  { %v32_v2 = vpop.xlane.xlu0 %31 }
  0xa2   :  { %v36_v3 = vmul.f32 0.0078125, %v32_v2 }
  0xa4   :  { %v38_v4 = vsub.f32 %v29_v0, %v36_v3 }
  0xa5   :  { %v34_v5 = vpop.xlane.xlu0 %33 }
  0xa6   :  { %v37_v6 = vmul.f32 0.0078125, %v34_v5  ;;  %v40_v7 = vmul.f32 %v38_v4, %v38_v4 }
  0xa8   :  { %v39_v8 = vsub.f32 %v30_v1, %v37_v6  ;;  %42 = vadd.xlane.f32.xlu1 %v40_v7 }
  0xaa   :  { %v41_v9 = vmul.f32 %v39_v8, %v39_v8 }
  0xac   :  { %44 = vadd.xlane.f32.xlu1 %v41_v9 }
 0x135   :  { %v43_v10 = vpop.xlane.xlu1 %42 }
 0x136   :  { %v47_v11 = vmul.f32 0.007874016, %v43_v10 }
 0x138   :  { %114 = vrsqrt.f32 %v47_v11  ;;  %vm51_vm0 = vcmp.eq.f32.partialorder %v47_v11, inf  ;;  %v54_v16 = vand.u32 2147483648, %v47_v11  ;;  %vm53_vm1 = vcmp.eq.f32.partialorder %v47_v11, 0.0 }
 0x139   :  { %v45_v12 = vpop.xlane.xlu1 %44 }
 0x13a   :  { %v48_v13 = vmul.f32 0.007874016, %v45_v12 }
 0x13c   :  { %116 = vrsqrt.f32 %v48_v13  ;;  %vm58_vm2 = vcmp.eq.f32.partialorder %v48_v13, inf  ;;  %v61_v22 = vand.u32 2147483648, %v48_v13  ;;  %vm60_vm3 = vcmp.eq.f32.partialorder %v48_v13, 0.0 }
 0x142   :  { %v115_v14 = vpop.eup %114 }
 0x143   :  { %v50_v15 = vmul.f32 %v115_v14, %v47_v11 }
 0x145   :  { %v52_v17 = vsel %vm51_vm0, %v47_v11, %v50_v15 }
 0x146   :  { %v117_v18 = vpop.eup %116  ;;  %v55_v19 = vsel %vm53_vm1, %v54_v16, %v52_v17 }
 0x147   :  { %v57_v20 = vmul.f32 %v117_v18, %v48_v13  ;;  %v63_v21 = vadd.f32 1e-06, %v55_v19 }
 0x149   :  { %v59_v23 = vsel %vm58_vm2, %v48_v13, %v57_v20  ;;  %118 = vrcp.f32 %v63_v21 }
 0x14a   :  { %v62_v24 = vsel %vm60_vm3, %v61_v22, %v59_v23 }
 0x14b   :  { %v64_v25 = vadd.f32 1e-06, %v62_v24 }
 0x14d   :  { %120 = vrcp.f32 %v64_v25 }
 0x153   :  { %v119_v26 = vpop.eup %118 }
 0x154   :  { %v70_v28 = vmul.f32 %v119_v26, %v38_v4 }
 0x156   :  { %v78_v30 = vmul.f32 %v108_v27, %v70_v28 }
 0x157   :  { %v121_v31 = vpop.eup %120 }
 0x158   :  { %v71_v32 = vmul.f32 %v121_v31, %v39_v8  ;;  %v87_v33 = vadd.f32 %v109_v29, %v78_v30 }
 0x15a   :  { %v79_v34 = vmul.f32 %v108_v27, %v71_v32  ;;  %89 = vst [vmem:[#allocation5] sm:$0xff] %v87_v33 }
 0x15c   :  { %v88_v35 = vadd.f32 %v109_v29, %v79_v34 }
 0x15e   :  { %90 = vst [vmem:[#allocation5 + $0x8] sm:$0xff] %v88_v35 }
 0x15f   :  { %155 = shalt.err (!%p152_p12)
}
 0x160   :  { %s156_s5 = scalar_lea.hbm %s233_s3, 256 }
 0x161   :  { %p157_p13 = scmp.ne.s32.totalorder %s233_s3, %s156_s5  ;;  %p160_p0 = scmp.lt.u32.totalorder %s156_s5, %s233_s3 }
 0x163   :  { %p162_p1 = pnand %p160_p0, %p157_p13 }
 0x165   :  { %165 = shalt.err (!%p162_p1)
}
 0x166   :  { %102 = dma.vmem_to_hbm [thread:$0]  %s97_s30, 256, %s233_s3, [#allocation4], %s171_s22, %s171_s22, %s172_s23  }
 0x167   :  { %168 = dma.done.wait [#allocation4], 256  }
 0x168   :  { %169 = vsyncadd [#allocation4], 4294967040 }
 0x169   :  { %106 = vsyncpa [#allocation3], 1 }
 0x16a   :  { %107 = vsyncpa [#allocation4], 1 }

</bundles_post_ra>
